<compile_context>
chip_gen: v6e
topology: v6e:2x2x1
jax: 0.10.0
libtpu: 0.0.40
codegen_flags: <defaults>
</compile_context>

<pallas_src>
import functools

import jax
import jax.numpy as jnp
from jax.experimental import pallas as pl
from jax.experimental.pallas import tpu as pltpu


def _round_up(x, m):
    return ((x + m - 1) // m) * m


# ---------------------------------------------------------------------------
# Pallas kernel: weighted expert accumulation over the per-tile active experts
# ---------------------------------------------------------------------------
def _moe_expert_kernel(act_ref, cnt_ref,                       # scalar-prefetch (SMEM)
                       x_ref, idx_ref, wts_ref, w_ref, b_ref,  # inputs (VMEM)
                       o_ref,                                  # output (VMEM)
                       acc_ref):                               # f32 scratch (bt, tn)
    bi = pl.program_id(0)
    e = pl.program_id(2)

    @pl.when(e == 0)
    def _():
        acc_ref[...] = jnp.zeros_like(acc_ref)

    # Skip experts that no token in THIS token tile selected (no MXU work;
    # the index_map repeats the last active id so no extra weight DMA either).
    @pl.when(e < cnt_ref[bi])
    def _():
        expert_id = act_ref[bi, e]
        # per-token routing weight for this expert: (bt, 1); 0 if not selected.
        w_tok = jnp.where(idx_ref[...] == expert_id,
                          wts_ref[...],                   # already f32
                          jnp.float32(0.0)).sum(axis=1, keepdims=True)
        # expert output for this (token tile, out-feature tile): (bt, tn), f32 acc.
        y = jnp.dot(x_ref[...], w_ref[...], preferred_element_type=jnp.float32)
        y = y + b_ref[...].astype(jnp.float32)
        acc_ref[...] += w_tok * y

    @pl.when(e == pl.num_programs(2) - 1)
    def _():
        o_ref[...] = acc_ref[...].astype(o_ref.dtype)


def _moe_expert_call(x, topk_idx, topk_w, w_stack, b_stack, act_ids, counts,
                     *, bt, tn, out_dtype):
    """All array shapes already padded: B % bt == 0, D_in % 128 == 0, D_out % tn == 0."""
    B, D_in = x.shape
    E, _, D_out = w_stack.shape
    k = topk_idx.shape[1]
    nbt = B // bt
    grid = (nbt, D_out // tn, E)

    # Cost estimate: flops is an upper bound (active experts only at runtime);
    # bytes models the real DMA pattern — weights re-streamed once per token
    # tile, x read once per token tile (not per N tile).
    flops = 2 * B * D_in * D_out * E
    bytes_accessed = int(
        nbt * E * D_in * D_out * w_stack.dtype.itemsize     # weights, per token tile
        + B * D_in * x.dtype.itemsize                        # x, once per token tile
        + B * D_out * jnp.dtype(out_dtype).itemsize          # output
        + nbt * E * D_out * b_stack.dtype.itemsize           # biases
        + B * k * (topk_idx.dtype.itemsize + topk_w.dtype.itemsize))

    # VMEM limit from the actual double-buffered working set + headroom
    # (do NOT claim the whole physical VMEM — v7x only has 64 MiB per TC).
    working = 2 * (bt * D_in * x.dtype.itemsize              # x tile
                   + D_in * tn * w_stack.dtype.itemsize      # weight tile
                   + tn * b_stack.dtype.itemsize             # bias tile
                   + bt * tn * jnp.dtype(out_dtype).itemsize # output tile
                   + bt * k * (4 + 4))                       # idx + f32 wts tiles
    working += bt * tn * 4                                   # f32 accumulator scratch
    vmem_limit = int(min(max(working + 16 * 1024 * 1024, 32 * 1024 * 1024),
                         128 * 1024 * 1024))

    # TODO(synk): for E_active/k >= ~2-4 a grouped-GEMM restructure (sort tokens
    # by expert, scalar-prefetch group offsets) removes the remaining wasted
    # dense-masked matmuls; for very large D_in add a K-tiling reduction axis.
    return pl.pallas_call(
        _moe_expert_kernel,
        out_shape=jax.ShapeDtypeStruct((B, D_out), out_dtype),
        grid_spec=pltpu.PrefetchScalarGridSpec(
            num_scalar_prefetch=2,  # act_ids (nbt, E), counts (nbt,)
            grid=grid,
            in_specs=[
                # x: (bt, D_in) token tile, resident across ni and e.
                pl.BlockSpec((bt, D_in), lambda bi, ni, e, act, cnt: (bi, 0)),
                # topk indices / f32 softmax weights: (bt, k).
                pl.BlockSpec((bt, k), lambda bi, ni, e, act, cnt: (bi, 0)),
                pl.BlockSpec((bt, k), lambda bi, ni, e, act, cnt: (bi, 0)),
                # expert weights: (D_in, tn) block of expert act[bi, e]; for
                # e >= counts[bi], act repeats the last active id so the block
                # index is unchanged and no extra weight DMA is issued.
                # (If weight DMA is still exposed, pipeline_mode=pl.Buffered(3)
                # on this spec adds a third buffer at D_in*tn*itemsize cost.)
                pl.BlockSpec((None, D_in, tn),
                             lambda bi, ni, e, act, cnt: (act[bi, e], 0, ni)),
                # expert bias: (1, tn) block of expert act[bi, e].
                pl.BlockSpec((None, 1, tn),
                             lambda bi, ni, e, act, cnt: (act[bi, e], 0, ni)),
            ],
            out_specs=pl.BlockSpec((bt, tn), lambda bi, ni, e, act, cnt: (bi, ni)),
            scratch_shapes=[pltpu.VMEM((bt, tn), jnp.float32)],
        ),
        compiler_params=pltpu.CompilerParams(
            # token and out-feature tiles independent (megacore shardable);
            # expert axis reduces into the resident accumulator.
            dimension_semantics=("parallel", "parallel", "arbitrary"),
            vmem_limit_bytes=vmem_limit,
        ),
        cost_estimate=pl.CostEstimate(flops=flops, transcendentals=0,
                                      bytes_accessed=bytes_accessed),
    )(act_ids, counts, x, topk_idx, topk_w, w_stack, b_stack)


# ---------------------------------------------------------------------------
# Parameter prep (run ONCE, outside the jitted forward): pad + cast weights
# ---------------------------------------------------------------------------
def pad_moe_params(w_stack, b_stack, *, block_n=256, compute_dtype=jnp.bfloat16):
    """
    w_stack: (E, D_in, D_out) expert weights, pre-transposed (y = x @ W_e)
    b_stack: (E, 1, D_out)
    Returns (w_pad, b_pad, tn) with lane-dense, tile-divisible feature dims.
    """
    E, D_in, D_out = w_stack.shape
    # 256-align K for the 2x256^2 MXU on v6e/v7x (128 is enough below 128).
    D_in_pad = _round_up(D_in, 128) if D_in <= 128 else _round_up(D_in, 256)
    tn = min(block_n, _round_up(D_out, 128))
    D_out_pad = _round_up(D_out, tn)
    if compute_dtype is not None:
        w_stack = w_stack.astype(compute_dtype)
        b_stack = b_stack.astype(compute_dtype)
    w_pad = jnp.pad(w_stack, ((0, 0), (0, D_in_pad - D_in), (0, D_out_pad - D_out)))
    b_pad = jnp.pad(b_stack, ((0, 0), (0, 0), (0, D_out_pad - D_out)))
    return w_pad, b_pad, tn


# ---------------------------------------------------------------------------
# Full MoE forward
# ---------------------------------------------------------------------------
@functools.partial(jax.jit,
                   static_argnames=("num_experts_per_tok", "d_out", "tn",
                                    "block_b", "compute_dtype"))
def moe_model_forward(x, w_pad, b_pad, wg, bg, *, num_experts_per_tok, d_out, tn,
                      block_b=512, compute_dtype=jnp.bfloat16):
    """
    x:     (B, D_in)
    w_pad: (E, D_in_pad, D_out_pad)  pre-padded expert weights (pad_moe_params)
    b_pad: (E, 1, D_out_pad)
    wg:    (D_in, E)                 gate weight, pre-transposed
    bg:    (1, E)
    """
    B, D_in = x.shape
    E, D_in_pad, D_out_pad = w_pad.shape
    k = num_experts_per_tok
    out_dtype = x.dtype

    # --- gate: tiny (B,D)x(D,E) GEMM + topk + softmax — plain JAX/XLA glue ---
    gate_logits = x @ wg + bg                                        # (B, E)
    topk_vals, topk_idx = jax.lax.top_k(gate_logits, k)              # (B, k)
    topk_w = jax.nn.softmax(topk_vals.astype(jnp.float32), axis=1)   # keep f32
    topk_idx = topk_idx.astype(jnp.int32)

    # --- low-precision activations (weights already cast in pad_moe_params) ---
    if compute_dtype is not None:
        x = x.astype(compute_dtype)

    # --- pad tokens to a tile-divisible batch ---
    bt = min(block_b, _round_up(B, 8))             # token tile
    B_pad = _round_up(B, bt)
    nbt = B_pad // bt
    # (On v7x keep nbt * (D_out_pad // tn) >= 2 so both TensorCores stay busy.)

    x_p = jnp.pad(x, ((0, B_pad - B), (0, D_in_pad - D_in)))
    idx_p = jnp.pad(topk_idx, ((0, B_pad - B), (0, 0)), constant_values=-1)
    wts_p = jnp.pad(topk_w, ((0, B_pad - B), (0, 0)))

    # --- per-token-tile active-expert schedule (compare/broadcast, no scatter) ---
    idx_t = idx_p.reshape(nbt, bt, k)
    hit = jnp.any(idx_t[..., None] == jnp.arange(E, dtype=jnp.int32),
                  axis=(1, 2))                                        # (nbt, E)
    counts = hit.sum(axis=1).astype(jnp.int32)                        # (nbt,)
    order = jnp.argsort(jnp.logical_not(hit).astype(jnp.int32),
                        axis=1).astype(jnp.int32)                     # active ids first
    last_active = jnp.take_along_axis(order,
                                      jnp.maximum(counts - 1, 0)[:, None],
                                      axis=1)                          # (nbt, 1)
    slot = jnp.arange(E, dtype=jnp.int32)[None, :]
    act_ids = jnp.where(slot < counts[:, None], order, last_active)    # (nbt, E)

    out = _moe_expert_call(x_p, idx_p, wts_p, w_pad, b_pad, act_ids, counts,
                           bt=bt, tn=tn, out_dtype=out_dtype)
    return out[:B, :d_out]


# ---------------------------------------------------------------------------
# Pure-JAX reference (mirrors the PyTorch forward) for a correctness check
# ---------------------------------------------------------------------------
def moe_reference(x, w_stack, b_stack, wg, bg, k):
    gate_logits = x @ wg + bg                                         # (B, E)
    topk_vals, topk_idx = jax.lax.top_k(gate_logits, k)
    topk_w = jax.nn.softmax(topk_vals.astype(jnp.float32), axis=1).astype(x.dtype)
    out = jnp.zeros_like(x)
    for e in range(w_stack.shape[0]):
        expert_out = x @ w_stack[e] + b_stack[e]                      # (B, D_out)
        w_e = jnp.where(topk_idx == e, topk_w, 0.0).sum(axis=1)       # (B,)
        out = out + w_e[:, None] * expert_out
    return out


# ---------------------------------------------------------------------------
if __name__ == "__main__":
    # small shapes consistent with the module (output_dim == input_dim is
    # required by the reference's `results = zeros_like(inputs)`).
    B = 8
    D = 32              # input_dim == output_dim
    E = 4               # num_experts
    K = 2               # num_experts_per_tok

    key = jax.random.PRNGKey(0)
    kx, kw, kb, kwg, kbg = jax.random.split(key, 5)

    x = jax.random.normal(kx, (B, D), dtype=jnp.float32)
    # experts: nn.Linear(D, D) -> weight (D_out, D_in); store transposed (E, D_in, D_out)
    w_stack = jax.random.normal(kw, (E, D, D), dtype=jnp.float32) * 0.1
    b_stack = jax.random.normal(kb, (E, 1, D), dtype=jnp.float32) * 0.1
    # gate: nn.Linear(D, E); store transposed (D, E)
    wg = jax.random.normal(kwg, (D, E), dtype=jnp.float32) * 0.1
    bg = jax.random.normal(kbg, (1, E), dtype=jnp.float32) * 0.1

    ref = moe_reference(x, w_stack, b_stack, wg, bg, K)

    # f32 compute path: strict numerical parity with the reference.
    w_pad32, b_pad32, tn32 = pad_moe_params(w_stack, b_stack, compute_dtype=None)
    out32 = moe_model_forward(x, w_pad32, b_pad32, wg, bg,
                              num_experts_per_tok=K, d_out=D, tn=tn32,
                              compute_dtype=None)
    out32 = jax.block_until_ready(out32)
    assert out32.shape == (B, D)
    assert jnp.allclose(out32, ref, atol=1e-4, rtol=1e-4), "f32 mismatch vs reference"

    # default bf16 compute path (halved weight HBM traffic, full bf16 MXU rate).
    w_pad16, b_pad16, tn16 = pad_moe_params(w_stack, b_stack)   # bf16 default
    out16 = moe_model_forward(x, w_pad16, b_pad16, wg, bg,
                              num_experts_per_tok=K, d_out=D, tn=tn16)
    out16 = jax.block_until_ready(out16)
    assert out16.shape == (B, D)
    assert jnp.allclose(out16, ref, atol=5e-2, rtol=5e-2), "bf16 mismatch vs reference"

    print("KERNEL_OK")
</pallas_src>

<mosaic_0001>
module attributes {stable_mosaic.version = 11 : i64} {
  func.func @_moe_expert_kernel(%arg0: i32, %arg1: i32, %arg2: i32, %arg3: memref<1x4xi32, #tpu.memory_space<smem>>, %arg4: memref<1xi32, #tpu.memory_space<smem>>, %arg5: memref<8x128xf32, #tpu.memory_space<vmem>>, %arg6: memref<8x2xi32, #tpu.memory_space<vmem>>, %arg7: memref<8x2xf32, #tpu.memory_space<vmem>>, %arg8: memref<1x128x128xf32, #tpu.memory_space<vmem>>, %arg9: memref<1x1x128xf32, #tpu.memory_space<vmem>>, %arg10: memref<8x128xf32, #tpu.memory_space<vmem>>, %arg11: memref<8x128xf32, #tpu.memory_space<vmem>>) attributes {dimension_semantics = [#tpu.dimension_semantics<parallel>, #tpu.dimension_semantics<parallel>, #tpu.dimension_semantics<arbitrary>], iteration_bounds = array<i64: 1, 1, 4>, scalar_prefetch = 2 : i64, scratch_operands = 1 : i64, tpu.core_type = #tpu.core_type<tc>, window_params = [{transform_indices = @transform_0, window_bounds = array<i64: 8, 128>}, {transform_indices = @transform_1, window_bounds = array<i64: 8, 2>}, {transform_indices = @transform_2, window_bounds = array<i64: 8, 2>}, {transform_indices = @transform_3, window_bounds = array<i64: 1, 128, 128>}, {transform_indices = @transform_4, window_bounds = array<i64: 1, 1, 128>}, {transform_indices = @transform_5, window_bounds = array<i64: 8, 128>}]} {
    %c0_i32 = arith.constant 0 : i32
    %0 = arith.cmpi eq, %arg2, %c0_i32 : i32
    %1 = arith.extui %0 : i1 to i32
    %c0_i32_0 = arith.constant 0 : i32
    %2 = arith.cmpi ne, %1, %c0_i32_0 : i32
    scf.if %2 {
      %cst = arith.constant 0.000000e+00 : f32
      %11 = vector.broadcast %cst : f32 to vector<8x128xf32>
      %c0 = arith.constant 0 : index
      %c0_3 = arith.constant 0 : index
      %12 = vector.load %arg11[%c0, %c0_3] : memref<8x128xf32, #tpu.memory_space<vmem>>, vector<8x128xf32>
      tpu.vector_store %arg11[%c0, %c0_3], %11 {strides = array<i32>} : memref<8x128xf32, #tpu.memory_space<vmem>>, vector<8x128xf32>,
    } else {
    }
    %3 = arith.index_cast %arg0 : i32 to index
    %4 = memref.load %arg4[%3] : memref<1xi32, #tpu.memory_space<smem>>
    %5 = arith.cmpi slt, %arg2, %4 : i32
    %6 = arith.extui %5 : i1 to i32
    %c0_i32_1 = arith.constant 0 : i32
    %7 = arith.cmpi ne, %6, %c0_i32_1 : i32
    scf.if %7 {
      %11 = arith.index_cast %arg0 : i32 to index
      %12 = arith.index_cast %arg2 : i32 to index
      %13 = memref.load %arg3[%11, %12] : memref<1x4xi32, #tpu.memory_space<smem>>
      %c0 = arith.constant 0 : index
      %c0_3 = arith.constant 0 : index
      %14 = vector.load %arg6[%c0, %c0_3] : memref<8x2xi32, #tpu.memory_space<vmem>>, vector<8x2xi32>
      %15 = vector.broadcast %13 : i32 to vector<8x2xi32>
      %16 = arith.cmpi eq, %14, %15 : vector<8x2xi32>
      %c0_4 = arith.constant 0 : index
      %c0_5 = arith.constant 0 : index
      %17 = vector.load %arg7[%c0_4, %c0_5] : memref<8x2xf32, #tpu.memory_space<vmem>>, vector<8x2xf32>
      %cst = arith.constant 0.000000e+00 : f32
      %18 = vector.broadcast %cst : f32 to vector<8x2xf32>
      %19 = arith.select %16, %17, %18 : vector<8x2xi1>, vector<8x2xf32>
      %cst_6 = arith.constant dense<0.000000e+00> : vector<8xf32>
      %20 = vector.multi_reduction <add>, %19, %cst_6 [1] : vector<8x2xf32> to vector<8xf32>
      %21 = vector.shape_cast %20 : vector<8xf32> to vector<8x1xf32>
      %c0_7 = arith.constant 0 : index
      %c0_8 = arith.constant 0 : index
      %22 = vector.load %arg5[%c0_7, %c0_8] : memref<8x128xf32, #tpu.memory_space<vmem>>, vector<8x128xf32>
      %c0_9 = arith.constant 0 : index
      %c0_10 = arith.constant 0 : index
      %c0_11 = arith.constant 0 : index
      %23 = vector.load %arg8[%c0_9, %c0_10, %c0_11] : memref<1x128x128xf32, #tpu.memory_space<vmem>>, vector<1x128x128xf32>
      %24 = vector.shape_cast %23 : vector<1x128x128xf32> to vector<128x128xf32>
      %cst_12 = arith.constant dense<0.000000e+00> : vector<8x128xf32>
      %25 = tpu.matmul %22, %24, %cst_12 {dimension_numbers = #tpu.dot_dimension_numbers<[1], [0], [0], [1], [0, 0, 1, 1], [], []>} : vector<8x128xf32>, vector<128x128xf32>, vector<8x128xf32> -> vector<8x128xf32>
      %c0_13 = arith.constant 0 : index
      %c0_14 = arith.constant 0 : index
      %c0_15 = arith.constant 0 : index
      %26 = vector.load %arg9[%c0_13, %c0_14, %c0_15] : memref<1x1x128xf32, #tpu.memory_space<vmem>>, vector<1x1x128xf32>
      %27 = vector.shape_cast %26 : vector<1x1x128xf32> to vector<1x128xf32>
      %28 = vector.broadcast %27 : vector<1x128xf32> to vector<8x128xf32>
      %29 = arith.addf %25, %28 : vector<8x128xf32>
      %c0_16 = arith.constant 0 : index
      %c0_17 = arith.constant 0 : index
      %30 = vector.load %arg11[%c0_16, %c0_17] : memref<8x128xf32, #tpu.memory_space<vmem>>, vector<8x128xf32>
      %31 = vector.broadcast %21 : vector<8x1xf32> to vector<8x128xf32>
      %32 = arith.mulf %31, %29 : vector<8x128xf32>
      %33 = arith.addf %30, %32 : vector<8x128xf32>
      %c0_18 = arith.constant 0 : index
      %c0_19 = arith.constant 0 : index
      %34 = vector.load %arg11[%c0_18, %c0_19] : memref<8x128xf32, #tpu.memory_space<vmem>>, vector<8x128xf32>
      tpu.vector_store %arg11[%c0_18, %c0_19], %33 {strides = array<i32>} : memref<8x128xf32, #tpu.memory_space<vmem>>, vector<8x128xf32>,
    } else {
    }
    %c3_i32 = arith.constant 3 : i32
    %8 = arith.cmpi eq, %arg2, %c3_i32 : i32
    %9 = arith.extui %8 : i1 to i32
    %c0_i32_2 = arith.constant 0 : i32
    %10 = arith.cmpi ne, %9, %c0_i32_2 : i32
    scf.if %10 {
      %c0 = arith.constant 0 : index
      %c0_3 = arith.constant 0 : index
      %11 = vector.load %arg11[%c0, %c0_3] : memref<8x128xf32, #tpu.memory_space<vmem>>, vector<8x128xf32>
      %c0_4 = arith.constant 0 : index
      %c0_5 = arith.constant 0 : index
      %12 = vector.load %arg10[%c0_4, %c0_5] : memref<8x128xf32, #tpu.memory_space<vmem>>, vector<8x128xf32>
      tpu.vector_store %arg10[%c0_4, %c0_5], %11 {strides = array<i32>} : memref<8x128xf32, #tpu.memory_space<vmem>>, vector<8x128xf32>,
    } else {
    }
    return
  }
  func.func @transform_0(%arg0: i32, %arg1: i32, %arg2: i32, %arg3: memref<1x4xi32, #tpu.memory_space<smem>>, %arg4: memref<1xi32, #tpu.memory_space<smem>>) -> (i32, i32) {
    %c0_i32 = arith.constant 0 : i32
    %c0_i32_0 = arith.constant 0 : i32
    return %arg0, %c0_i32 : i32, i32
  }
  func.func @transform_1(%arg0: i32, %arg1: i32, %arg2: i32, %arg3: memref<1x4xi32, #tpu.memory_space<smem>>, %arg4: memref<1xi32, #tpu.memory_space<smem>>) -> (i32, i32) {
    %c0_i32 = arith.constant 0 : i32
    %c0_i32_0 = arith.constant 0 : i32
    return %arg0, %c0_i32 : i32, i32
  }
  func.func @transform_2(%arg0: i32, %arg1: i32, %arg2: i32, %arg3: memref<1x4xi32, #tpu.memory_space<smem>>, %arg4: memref<1xi32, #tpu.memory_space<smem>>) -> (i32, i32) {
    %c0_i32 = arith.constant 0 : i32
    %c0_i32_0 = arith.constant 0 : i32
    return %arg0, %c0_i32 : i32, i32
  }
  func.func @transform_3(%arg0: i32, %arg1: i32, %arg2: i32, %arg3: memref<1x4xi32, #tpu.memory_space<smem>>, %arg4: memref<1xi32, #tpu.memory_space<smem>>) -> (i32, i32, i32) {
    %0 = arith.index_cast %arg0 : i32 to index
    %1 = arith.index_cast %arg2 : i32 to index
    %2 = memref.load %arg3[%0, %1] : memref<1x4xi32, #tpu.memory_space<smem>>
    %c0_i32 = arith.constant 0 : i32
    %c0_i32_0 = arith.constant 0 : i32
    return %2, %c0_i32, %arg1 : i32, i32, i32
  }
  func.func @transform_4(%arg0: i32, %arg1: i32, %arg2: i32, %arg3: memref<1x4xi32, #tpu.memory_space<smem>>, %arg4: memref<1xi32, #tpu.memory_space<smem>>) -> (i32, i32, i32) {
    %0 = arith.index_cast %arg0 : i32 to index
    %1 = arith.index_cast %arg2 : i32 to index
    %2 = memref.load %arg3[%0, %1] : memref<1x4xi32, #tpu.memory_space<smem>>
    %c0_i32 = arith.constant 0 : i32
    %c0_i32_0 = arith.constant 0 : i32
    return %2, %c0_i32, %arg1 : i32, i32, i32
  }
  func.func @transform_5(%arg0: i32, %arg1: i32, %arg2: i32, %arg3: memref<1x4xi32, #tpu.memory_space<smem>>, %arg4: memref<1xi32, #tpu.memory_space<smem>>) -> (i32, i32) {
    %c0_i32 = arith.constant 0 : i32
    return %arg0, %arg1 : i32, i32
  }
}

</mosaic_0001>

<bundles_post_ra>
// kernel: moe_model_forward.1
= control target key start
LH: loop header
LB: loop body
LE: loop exit
PB: predicated region body
PF: predicated region fallthrough
CT: control target
= control target key end

     0   :  { %s1200_s0 = inlined_call_operand.vmem [shape: s32[1,4], index: 0, kind: input, shape index: {}]   ;;  %s1201_s1 = inlined_call_operand.<no memory space> [shape: s32[1], index: 1, kind: input, shape index: {}]   ;;  %s1202_s2 = inlined_call_operand.vmem [shape: f32[8,128], index: 2, kind: input, shape index: {}]   ;;  %s1203_s3 = inlined_call_operand.vmem [shape: s32[8,2], index: 3, kind: input, shape index: {}]   ;;  %s1204_s4 = inlined_call_operand.vmem [shape: f32[8,2], index: 4, kind: input, shape index: {}]   ;;  %s1205_s5 = inlined_call_operand.hbm [shape: f32[4,128,128], index: 5, kind: input, shape index: {}]   ;;  %s1206_s6 = inlined_call_operand.vmem [shape: f32[4,1,128], index: 6, kind: input, shape index: {}]   ;;  %s1207_s7 = inlined_call_operand.hbm [shape: f32[8,128], index: 7, kind: output, shape index: {}]  }
   0x1   :  { %s12_s26 = sshll.u32 %s1200_s0, 4  ;;  %16 = sst [smem:[#allocation5]] %s1201_s1  ;;  %s13_s26 = int_to_ptr.vmem [resolvable:$true] %s12_s26 }
   0x2   :  { %s849_s29 = scalar_lea.vmem %s13_s26, 16  ;;  %p854_p1 = scmp.lt.s32.totalorder %s13_s26, %s13_s26 }
   0x3   :  { %p850_p0 = scmp.ne.s32.totalorder %s13_s26, %s849_s29  ;;  %p855_p2 = scmp.lt.s32.totalorder %s849_s29, %s849_s29 }
   0x5   :  { %p856_p3 = por %p855_p2, %p854_p1 }
   0x7   :  { %p857_p4 = pnand %p856_p3, %p850_p0 }
   0x9   :  { %860 = shalt.err (!%p857_p4)  }
   0xa   :  { %s971_s30 = smov [#allocation4]  }
   0xb   :  { %15 = dma.vmem_to_smem %s13_s26, 16, %s971_s30, [#allocation3] }
   0xc   :  { %937 = dma.done.wait [#allocation3], 16 }
   0xd   :  { %938 = vsyncadd [#allocation3], 4294967280 }
   0xe   :  { %18 = sfence }
   0xf   :  { %19 = vsyncpa [#allocation7], 0 }
  0x10   :  { %21 = vsyncpa [#allocation7 + $0x1], 0 }
  0x11   :  { %22 = vsyncpa [#allocation8], 0  ;;  %s1025_s0 = smov 0   ;;  %s1027_s8 = smov 0  }
  0x12   :  { %s1029_s1 = smov 0   ;;  %s1031_s9 = smov 0  }
  0x13   :  { %s1033_s10 = smov 0   ;;  %s1035_s11 = smov 0  }
  0x14 LB: > { %s40_s12 = sadd.s32 1, %s965_s10  ;;  %s129_s13 = sshra.s32 %s965_s10, 7  ;;  %s969_s11 = sphi %s1035_s11, %s28_s11   ;;  %s965_s10 = sphi %s1033_s10, %s1219_s10   ;;  %s961_s9 = sphi %s1031_s9, %s1218_s9   ;;  %s957_s1 = sphi %s1029_s1, %s1217_s1   ;;  %s953_s8 = sphi %s1027_s8, %s1216_s8   ;;  %s949_s0 = sphi %s1025_s0, %s1215_s0  }
  0x15   : > { %p41_p5 = scmp.ge.s32.totalorder %s40_s12, 4  ;;  %s699_s14 = sshll.u32 %s129_s13, 7 }
  0x16   : > { %s134_s15 = sand.u32 127, %s965_s10  ;;  %s698_s16 = sadd.s32 4294967295, %s969_s11  }
  0x17   : > { %s1221_s12 = smov (%p41_p5, %s40_s12), 0  ;;  %s135_s17 = sadd.s32 %s699_s14, %s134_s15 }
  0x18   : > { %s136_s18 = sld [smem:[#allocation4 + %s135_s17]]  ;;  %s137_s19 = sshra.s32 %s1221_s12, 7 }
  0x19   : > { %s700_s20 = sshll.u32 %s137_s19, 7  ;;  %s142_s21 = sand.u32 127, %s1221_s12 }
  0x1a   : > { %s143_s22 = sadd.s32 %s700_s20, %s142_s21  ;;  %p157_p6 = scmp.ne.s32.totalorder %s957_s1, %s953_s8 }
  0x1b   : > { %s144_s23 = sld [smem:[#allocation4 + %s143_s22]]  ;;  %p158_p7 = scmp.eq.s32.totalorder %s969_s11, 0 }
  0x1c   : > { %p163_p8 = scmp.ne.s32.totalorder %s953_s8, %s949_s0  ;;  %p164_p9 = scmp.eq.s32.totalorder %s698_s16, 0 }
  0x1d   : > { %p159_p11 = por %p158_p7, %p157_p6  ;;  %s280_s25 = sand.u32 1, %s957_s1  }
  0x1e   : > { %p1067_p10 = por %p164_p9, %p163_p8  ;;  %s150_s26 = sadd.s32 1, %s957_s1 }
  0x1f   : > { %p791_p12 = scmp.lt.s32.totalorder %s969_s11, 4  ;;  %s708_s28 = sshll.u32 %s280_s25, 7 }
  0x20   : > { %s1209_s24 = scalar_select %p1067_p10, 1, 0 }
  0x21   : > { %s145_s27 = ssub.s32 %s136_s18, %s144_s23  ;;  %s1223_s17 = smov (!%p159_p11, %s135_s17), 0 }
  0x22   : > { %p148_p13 = scmp.eq.s32.totalorder %s145_s27, 0  ;;  %s1227_s17 = smov (!%p791_p12, %s1223_s17), 0 }
  0x23   : > { %s777_s29 = scalar_select %p159_p11, [#allocation4], [#allocation10] }
  0x24   : > { %s1075_s30 = scalar_select %p148_p13, %s957_s1, %s150_s26  }
  0x25   : > { %s1225_s29 = smov (!%p791_p12, %s777_s29), [#allocation11]  ;;  %p1077_p0 = pnand %p791_p12, %p159_p11 }
  0x26   : > { %s292_s13 = sld [smem:[%s1225_s29 + %s1227_s17]]  ;;  %p712_p1 = scmp.ge.s32.totalorder %s969_s11, 1 }
  0x27   : > { %s284_s14 = scalar_lea.vmem [#allocation6], %s708_s28  ;;  %p333_p2 = scmp.lt.s32.totalorder %s969_s11, 5 }
  0x28   : > { %s300_s15 = sshll.u32 %s284_s14, 4  ;;  %s1094_s17 = scalar_lea.sflag [#allocation7], %s280_s25  ;;  %s1087_s15 = int_to_ptr.vmem [resolvable:$true] %s300_s15 }
  0x29   : > { %p1083_p3 = pnand %p712_p1, %p333_p2  ;;  %p863_p5 = pneg %p1077_p0 }
  0x2a   : > { %s866_s28 = scalar_lea.hbm %s1205_s5, 8192 }
  0x2b   : > { %s1211_s18 = scalar_select %p1083_p3, 1, 0 }
  0x2c   : > { %s724_s19 = sshll.u32 %s292_s13, 11 }
  0x2d   : > { %s1092_s22 = scalar_lea.hbm %s1205_s5, %s724_s19 }
  0x2e   : > { %s861_s23 = scalar_lea.hbm %s1092_s22, 2048  ;;  %p867_p8 = scmp.lt.s32.totalorder %s1092_s22, %s1205_s5 }
  0x2f   : > { %p862_p4 = scmp.ne.s32.totalorder %s1092_s22, %s861_s23  ;;  %p868_p9 = scmp.lt.s32.totalorder %s866_s28, %s861_s23 }
  0x31   : > { %p864_p6 = pnand %p863_p5, %p862_p4  ;;  %p869_p11 = por %p868_p9, %p867_p8 }
  0x33   : > { %p865_p7 = pneg %p864_p6 }
  0x35   : > { %p870_p12 = pnand %p869_p11, %p865_p7 }
  0x37   : > { %873 = shalt.err (!%p870_p12)
}
  0x38   : > { %s874_s25 = scalar_lea.vmem %s1087_s15, 2048  ;;  %s972_s14 = smov [#allocation6]  }
  0x39   : > { %p875_p13 = scmp.ne.s32.totalorder %s1087_s15, %s874_s25  ;;  %s879_s19 = sshll.u32 %s972_s14, 4  ;;  %s880_s19 = int_to_ptr.vmem [resolvable:$false] %s879_s19 }
  0x3a   : > { %s881_s20 = scalar_lea.vmem %s880_s19, 4096  ;;  %p882_p4 = scmp.lt.s32.totalorder %s1087_s15, %s880_s19 }
  0x3b   : > { %p877_p1 = pnand %p875_p13, %p863_p5  ;;  %p883_p6 = scmp.lt.s32.totalorder %s881_s20, %s874_s25 }
  0x3d   : > { %p878_p2 = pneg %p877_p1  ;;  %p884_p10 = por %p883_p6, %p882_p4 }
  0x3f   : > { %p885_p3 = pnand %p884_p10, %p878_p2 }
  0x41   : > { %888 = shalt.err (!%p885_p3)
}
  0x42   : > { %s973_s21 = smov 128   ;;  %s974_s23 = smov 8  }
  0x43   : > { %790 = dma.hbm_to_vmem [thread:$0]  (!%p1077_p0), %s1092_s22, 2048, %s1087_s15, %s1094_s17, %s973_s21, %s973_s21, %s974_s23  }
  0x44   : > { %p1212_p5 = scmp.ne.s32.totalorder %s1211_s18, 0 }
  0x45   : > { %s339_s26 = sand.u32 (!%p1212_p5), 1, %s953_s8   ;;  %p1213_p10 = scmp.ne.s32.totalorder (!%p1212_p5), %s1209_s24, 0 }
  0x46   : > { %337 = sbr.rel (%p1212_p5) target bundleno = 361 (0x169), region = 40  ;;  %s713_s27 = sshll.u32 (!%p1212_p5), %s339_s26, 7 }
  0x47   : > { %s340_s28 = scalar_lea.sflag (!%p1212_p5), [#allocation7], %s339_s26  ;;  %s1118_s29 = scalar_lea.vmem (!%p1212_p5), [#allocation6], %s713_s27 }
  0x4b   : > { %940 = dma.done.wait (%p1213_p10), %s340_s28, 2048  }
  0x4c   : > { %942 = vsyncadd (%p1213_p10), %s340_s28, 4294965248  ;;  %s411_s13 = sshra.s32 %s961_s9, 7  ;;  %s416_s0 = sand.u32 127, %s961_s9 }
  0x4d   : > { %s714_s15 = sshll.u32 %s411_s13, 7  ;;  %p715_p3 = scmp.ne.s32.totalorder %s961_s9, 0 }
  0x4e   : > { %s417_s22 = sadd.s32 %s714_s15, %s416_s0 }
  0x4f   : > { %s418_s18 = sld [smem:[#allocation4 + %s417_s22]] }
  0x54   : > { %436 = sbr.rel (%p715_p3) target bundleno = 91 (0x5b), region = 48 }
  0x55   : > { %p419_p0 = scmp.lt.s32.totalorder %s418_s18, 3 }
  0x57   : > { %s1229_s18 = smov (!%p419_p0, %s418_s18), 3 }
  0x58   : > { %s424_s14 = scalar_lea.vmem %s1206_s6, %s1229_s18 }
  0x59   : > { %v975_v0 = vmov 0.0  }
  0x5a   : > { %437 = vst [vmem:[#allocation2] sm:$0xff] %v975_v0 }
  0x5b PF: > { %s438_s24 = sld [smem:[#allocation5]] }
  0x61   : > { %p716_p7 = scmp.ge.s32.totalorder %s961_s9, %s438_s24 }
  0x62   : > { %s450_s19 = sld [smem:[#allocation4 + %s417_s22]] (!%p716_p7) }
  0x63   : > { %442 = sbr.rel (%p716_p7) target bundleno = 337 (0x151), region = 52 }
  0x68   : > { %v476_v1 = vld [vmem:[%s1118_s29 + $0x78] sm:$0xff]  ;;  %v976_v2 = vmov 0.0   ;;  %v475_v3 = vld [vmem:[%s1118_s29 + $0x70] sm:$0xff]  ;;  %vm977_vm0 = vmmov 0   ;;  %v474_v4 = vld [vmem:[%s1118_s29 + $0x68] sm:$0xff]  ;;  %v452_v7 = vstv %s450_s19  ;;  %vm456_vm1 = vcmask 15360  }
  0x69   : > { %742 = vmatprep.subr.mxu0 %v976_v2  ;;  %774 = vmatprep.mubr.msk.f32.mxu0 %vm977_vm0, %v976_v2  ;;  %v473_v5 = vld [vmem:[%s1118_s29 + $0x60] sm:$0xff]  ;;  %v451_v6 = vld [vmem:[%s1203_s3] sm:$0xff]  ;;  %v471_v11 = vld [vmem:[%s1118_s29 + $0x50] sm:$0xff] }
  0x6a   : > { %743 = vmatpush3.msra.mxu0 %v476_v1  ;;  %v454_v8 = vld [vmem:[%s1204_s4] sm:$0xff]  ;;  %vm453_vm2 = vcmp.eq.s32.totalorder %v451_v6, %v452_v7  ;;  %v470_v13 = vld [vmem:[%s1118_s29 + $0x48] sm:$0xff]  ;;  %v469_v14 = vld [vmem:[%s1118_s29 + $0x40] sm:$0xff] }
  0x6b   : > { %744 = vmatprep.subr.mxu0 %v976_v2  ;;  %v472_v9 = vld [vmem:[%s1118_s29 + $0x58] sm:$0xff]  ;;  %v455_v10 = vsel %vm453_vm2, %v454_v8, 0.0  ;;  %v467_v16 = vld [vmem:[%s1118_s29 + $0x30] sm:$0xff]  ;;  %v466_v17 = vld [vmem:[%s1118_s29 + $0x28] sm:$0xff] }
  0x6c   : > { %745 = vmatpush3.msra.mxu0 %v475_v3  ;;  %v457_v12 = vsel %vm456_vm1, %v455_v10, 0.0  ;;  %v468_v15 = vld [vmem:[%s1118_s29 + $0x38] sm:$0xff]  ;;  %v465_v18 = vld [vmem:[%s1118_s29 + $0x20] sm:$0xff]  ;;  %v463_v20 = vld [vmem:[%s1118_s29 + $0x10] sm:$0xff] }
  0x6d   : > { %746 = vmatprep.subr.mxu0 %v976_v2  ;;  %458 = vadd.xlane.f32.xlu0 %v457_v12  ;;  %v464_v19 = vld [vmem:[%s1118_s29 + $0x18] sm:$0xff]  ;;  %v462_v21 = vld [vmem:[%s1118_s29 + $0x8] sm:$0xff]  ;;  %v461_v22 = vld [vmem:[%s1118_s29] sm:$0xff] }
  0x6e   : > { %747 = vmatpush3.msra.mxu0 %v474_v4  ;;  %v460_v23 = vld [vmem:[%s1202_s2] sm:$0xff] }
  0x6f   : > { %748 = vmatprep.subr.mxu0 %v976_v2  ;;  %v718_v24 = vld [vmem:[%s424_s14] ss:$0 sm:$0xff] }
  0x70   : > { %749 = vmatpush3.msra.mxu0 %v473_v5  ;;  %v554_v28 = vld [vmem:[#allocation2] sm:$0xff] }
  0x71   : > { %750 = vmatprep.subr.mxu0 %v976_v2 }
  0x72   : > { %751 = vmatpush3.msra.mxu0 %v472_v9 }
  0x73   : > { %752 = vmatprep.subr.mxu0 %v976_v2 }
  0x74   : > { %753 = vmatpush3.msra.mxu0 %v471_v11 }
  0x75   : > { %754 = vmatprep.subr.mxu0 %v976_v2 }
  0x76   : > { %755 = vmatpush3.msra.mxu0 %v470_v13 }
  0x77   : > { %756 = vmatprep.subr.mxu0 %v976_v2 }
  0x78   : > { %757 = vmatpush3.msra.mxu0 %v469_v14 }
  0x79   : > { %758 = vmatprep.subr.mxu0 %v976_v2 }
  0x7a   : > { %759 = vmatpush3.msra.mxu0 %v468_v15 }
  0x7b   : > { %760 = vmatprep.subr.mxu0 %v976_v2 }
  0x7c   : > { %761 = vmatpush3.msra.mxu0 %v467_v16 }
  0x7d   : > { %762 = vmatprep.subr.mxu0 %v976_v2 }
  0x7e   : > { %763 = vmatpush3.msra.mxu0 %v466_v17 }
  0x7f   : > { %764 = vmatprep.subr.mxu0 %v976_v2 }
  0x80   : > { %765 = vmatpush3.msra.mxu0 %v465_v18 }
  0x81   : > { %766 = vmatprep.subr.mxu0 %v976_v2 }
  0x82   : > { %767 = vmatpush3.msra.mxu0 %v464_v19 }
  0x83   : > { %768 = vmatprep.subr.mxu0 %v976_v2 }
  0x84   : > { %769 = vmatpush3.msra.mxu0 %v463_v20 }
  0x85   : > { %770 = vmatprep.subr.mxu0 %v976_v2 }
  0x86   : > { %771 = vmatpush3.msra.mxu0 %v462_v21 }
  0x87   : > { %772 = vmatprep.subr.mxu0 %v976_v2 }
  0x88   : > { %773 = vmatpush3.msra.mxu0 %v461_v22 }
  0x89   : > { %775 = vmatmul.mubr.f32.vlgmr.msra.gmra.mxu0 %v460_v23 }
  0xf6   : > { %v459_v26 = vpop.xlane.xlu0 %458 }
 0x149   : > { %v550_v25 = vpop.f32.mrf.mxu0 }
 0x14a   : > { %v551_v27 = vadd.f32 %v718_v24, %v550_v25 }
 0x14b   : > { %v776_v29 = vpop.f32.mrf.mxu0 }
 0x14c   : > { %v555_v30 = vmul.f32 %v551_v27, %v459_v26 }
 0x14e   : > { %v556_v31 = vadd.f32 %v555_v30, %v554_v28 }
 0x150   : > { %557 = vst [vmem:[#allocation2] sm:$0xff] %v556_v31 }
 0x151 PF: > { %p719_p8 = scmp.ne.s32.totalorder %s961_s9, 3 }
 0x153   : > { %561 = sbr.rel (%p719_p8) target bundleno = 346 (0x15a), region = 56 }
 0x158   : > { %v562_v32 = vld [vmem:[#allocation2] sm:$0xff] }
 0x159   : > { %563 = vst [vmem:[#allocation9] sm:$0xff] %v562_v32 }
 0x15a PF: > { %p1167_p9 = scmp.eq.s32.totalorder %s698_s16, 3  ;;  %s978_s15 = smov [#allocation9]  }
 0x15b   : > { %s574_s22 = sshll.u32 %s978_s15, 4  ;;  %s575_s22 = int_to_ptr.vmem [resolvable:$true] %s574_s22 }
 0x15c   : > { %s889_s18 = scalar_lea.vmem %s575_s22, 128  ;;  %p896_p1 = scmp.lt.s32.totalorder %s575_s22, %s575_s22 }
 0x15d   : > { %p890_p11 = scmp.ne.s32.totalorder %s575_s22, %s889_s18  ;;  %p897_p2 = scmp.lt.s32.totalorder %s889_s18, %s889_s18 }
 0x15f   : > { %p891_p12 = pnand %p890_p11, %p1167_p9  ;;  %p898_p4 = por %p897_p2, %p896_p1 }
 0x161   : > { %p892_p13 = pneg %p891_p12 }
 0x163   : > { %p899_p6 = pnand %p898_p4, %p892_p13 }
 0x165   : > { %902 = shalt.err (!%p899_p6)
}
 0x166   : > { %782 = dma.vmem_to_hbm [thread:$0]  (%p1167_p9), %s575_s22, 128, %s1207_s7, [#allocation8]  }
 0x167   : > { %944 = dma.done.wait (%p1167_p9), [#allocation8], 128  }
 0x168   : > { %946 = vsyncadd (%p1167_p9), [#allocation8], 4294967168 }
 0x169 PF: > { %s28_s11 = sadd.s32 1, %s969_s11   ;;  %s1215_s0 = smov %s953_s8 }
 0x16a   : > { %p25_p5 = scmp.ge.s32.totalorder %s28_s11, 6   ;;  %s1216_s8 = smov %s957_s1 }
 0x16b   : > { %s1217_s1 = smov %s1075_s30  ;;  %s1218_s9 = smov %s965_s10 }
 0x16c   : > { %s1219_s10 = smov %s1221_s12  ;;  %27 = sbr.rel (!%p25_p5) target bundleno = 20 (0x14), region = 102 }
 0x171   :  { %587 = vsyncpa [#allocation7], 1 }
 0x172   :  { %589 = vsyncpa [#allocation7 + $0x1], 1 }
 0x173   :  { %590 = vsyncpa [#allocation8], 1 }
 0x174   :  { %592 = vsyncpa [#allocation8 + $0x1], 1 }

</bundles_post_ra>
